<compile_context>
chip_gen: v7x
topology: tpu7x:2x2x1
jax: 0.10.0
libtpu: 0.0.40
codegen_flags: <defaults>
</compile_context>

<pallas_src>
import jax
import jax.numpy as jnp
from jax import lax
from jax.experimental import pallas as pl
from jax.experimental.pallas import tpu as pltpu


# ----------------------------------------------------------------------------
# Interpolation matrix for 1-D linear resize with align_corners=True
# ----------------------------------------------------------------------------
def _interp_matrix(in_size, out_size):
    """A of shape (out_size, in_size) with y = A @ x the align_corners=True
    linear resize along that axis (matches PyTorch semantics)."""
    if out_size == in_size:
        return jnp.eye(in_size, dtype=jnp.float32)
    if in_size == 1:
        return jnp.ones((out_size, 1), jnp.float32)
    if out_size == 1:
        return jnp.zeros((1, in_size), jnp.float32).at[0, 0].set(1.0)
    pos = jnp.arange(out_size, dtype=jnp.float32) * (in_size - 1) / (out_size - 1)
    lo = jnp.clip(jnp.floor(pos).astype(jnp.int32), 0, in_size - 2)
    frac = pos - lo.astype(jnp.float32)
    onehot_lo = jax.nn.one_hot(lo, in_size, dtype=jnp.float32)
    onehot_hi = jax.nn.one_hot(lo + 1, in_size, dtype=jnp.float32)
    return onehot_lo * (1.0 - frac)[:, None] + onehot_hi * frac[:, None]


# ----------------------------------------------------------------------------
# Pallas kernel: fused  A_h @ x[c] @ A_w^T  for a block of channel images
# ----------------------------------------------------------------------------
def _make_kernel(w_first, flatten):
    """w_first: do the W-axis GEMM first.  flatten: the W-axis GEMM may merge
    (tb, R) into one M dimension (layout-trivial only when R is sublane
    aligned for the dtype); otherwise both GEMMs are broadcast-batched."""

    def kernel(ah_ref, awt_ref, x_ref, o_ref):
        tb, Hi, Wi = x_ref.shape
        Ho = ah_ref.shape[0]
        tw = awt_ref.shape[1]
        x = x_ref[...]
        ah = ah_ref[...]
        awt = awt_ref[...]

        def wdot(v):  # (tb, R, Wi) -> (tb, R, tw), contract over Wi
            r_dim = v.shape[1]
            if flatten:
                r = jnp.dot(v.reshape(tb * r_dim, Wi), awt,
                            preferred_element_type=jnp.float32)
                return r.reshape(tb, r_dim, tw)
            awt_b = jnp.broadcast_to(awt[None], (tb, Wi, tw))
            return lax.dot_general(
                v, awt_b, (((2,), (1,)), ((0,), (0,))),
                preferred_element_type=jnp.float32)

        def hdot(v):  # (tb, Hi, Cw) -> (tb, Ho, Cw), contract over Hi
            ah_b = jnp.broadcast_to(ah[None], (tb, Ho, Hi))
            return lax.dot_general(
                ah_b, v, (((2,), (1,)), ((0,), (0,))),
                preferred_element_type=jnp.float32)

        if w_first:
            xw = wdot(x).astype(x.dtype)     # keep MXU operands narrow (bf16 path)
            y = hdot(xw)
        else:
            xh = hdot(x).astype(x.dtype)
            y = wdot(xh)
        o_ref[...] = y.astype(o_ref.dtype)

    return kernel


def interpolate_bilinear_align_corners(x, size):
    """x: (B, C, Hi, Wi) -> (B, C, Ho, Wo), bilinear, align_corners=True."""
    B, C, Hi, Wi = x.shape
    Ho, Wo = int(size[0]), int(size[1])
    itemsize = x.dtype.itemsize

    # Interp matrices in the MXU operand dtype (bf16 stays bf16; else f32).
    mat_dtype = jnp.bfloat16 if x.dtype == jnp.bfloat16 else jnp.float32
    ah = _interp_matrix(Hi, Ho).astype(mat_dtype)      # (Ho, Hi)
    awt = _interp_matrix(Wi, Wo).T.astype(mat_dtype)   # (Wi, Wo)
    mat_itemsize = jnp.dtype(mat_dtype).itemsize

    BC = B * C
    xr = x.reshape(BC, Hi, Wi)   # free reshape (contiguous), no HBM copy

    # --- Wo tile (lane-dense, multiple of 128 when Wo allows it) -------------
    tw = Wo
    if Wo >= 256 and Wo % 128 == 0:
        for cand in (512, 384, 256, 128):
            if Wo % cand == 0:
                tw = cand
                break
    nw = Wo // tw

    # --- GEMM order (force W-first when Wo is tiled: zero recompute) ---------
    w_first = (nw > 1) or (Hi * Wo * (Wi + Ho) <= Ho * Wi * (Hi + Wo))

    # --- channel block: largest divisor of B*C inside a VMEM budget ----------
    def per_step_bytes(tb):
        io = 2 * tb * (Hi * Wi + Ho * tw) * itemsize            # dbl-buffered I/O
        mats = 2 * (Ho * Hi + Wi * tw) * mat_itemsize
        interm = tb * (Hi * tw + Ho * tw + Ho * Hi) * 4         # f32 temps (rough)
        return io + mats + interm

    budget = 20 * 1024 * 1024
    tb = 1
    for cand in range(1, min(BC, 16) + 1):
        if BC % cand == 0 and per_step_bytes(cand) <= budget:
            tb = cand
    nbc = BC // tb

    # --- flatten the W-GEMM only when the (tb, R) merge is layout-trivial ----
    sub = 8 * max(1, 4 // itemsize)          # sublane tile: 8 (f32), 16 (bf16)
    flatten = (Hi % sub == 0) if w_first else (Ho % sub == 0)

    if w_first:
        flops = 2 * BC * (Hi * Wi * Wo + Ho * Hi * Wo)
    else:
        flops = 2 * BC * (Ho * Hi * Wi + Ho * Wi * Wo)
    bytes_accessed = (BC * Hi * Wi + BC * Ho * Wo) * itemsize \
        + (Ho * Hi + Wi * Wo) * mat_itemsize

    out = pl.pallas_call(
        _make_kernel(w_first, flatten),
        out_shape=jax.ShapeDtypeStruct((BC, Ho, Wo), x.dtype),
        grid_spec=pltpu.PrefetchScalarGridSpec(
            num_scalar_prefetch=0,
            grid=(nbc, nw),
            in_specs=[
                pl.BlockSpec((Ho, Hi), lambda i, j: (0, 0)),       # A_h (full)
                pl.BlockSpec((Wi, tw), lambda i, j: (0, j)),       # A_w^T tile
                pl.BlockSpec((tb, Hi, Wi), lambda i, j: (i, 0, 0)),  # reused over j
            ],
            out_specs=pl.BlockSpec((tb, Ho, tw), lambda i, j: (i, 0, j)),
        ),
        compiler_params=pltpu.CompilerParams(
            dimension_semantics=("parallel", "parallel"),
            vmem_limit_bytes=48 * 1024 * 1024),
        cost_estimate=pl.CostEstimate(
            flops=flops, transcendentals=0, bytes_accessed=bytes_accessed),
    )(ah, awt, xr)
    return out.reshape(B, C, Ho, Wo)


class Interpolate:
    """Mirror of the PyTorch module: forward(x, size)."""

    def __init__(self, mode="bilinear"):
        self.mode = mode

    def __call__(self, x, size):
        if self.mode != "bilinear" or x.ndim != 4:
            # TODO(synk): modes other than 4-D 'bilinear' (e.g. 'trilinear',
            # 'nearest', 'bicubic') are not implemented in this kernel.
            raise NotImplementedError(self.mode)
        return interpolate_bilinear_align_corners(x, tuple(size))


# ----------------------------------------------------------------------------
# Pure-JAX reference (gather + lerp) for correctness checking
# ----------------------------------------------------------------------------
def _reference_interpolate(x, size):
    def resize_axis(x, axis, out_size):
        in_size = x.shape[axis]
        if in_size == out_size:
            return x
        if out_size == 1:
            return jnp.take(x, jnp.array([0]), axis=axis)
        if in_size == 1:
            return jnp.repeat(x, out_size, axis=axis)
        pos = jnp.arange(out_size, dtype=jnp.float32) * (in_size - 1) / (out_size - 1)
        lo = jnp.clip(jnp.floor(pos).astype(jnp.int32), 0, in_size - 2)
        frac = pos - lo.astype(jnp.float32)
        x_lo = jnp.take(x, lo, axis=axis)
        x_hi = jnp.take(x, lo + 1, axis=axis)
        shape = [1] * x.ndim
        shape[axis] = out_size
        frac = frac.reshape(shape)
        return x_lo * (1.0 - frac) + x_hi * frac

    x = resize_axis(x.astype(jnp.float32), 2, size[0])
    x = resize_axis(x, 3, size[1])
    return x


# ----------------------------------------------------------------------------
if __name__ == "__main__":
    key = jax.random.PRNGKey(0)
    x = jax.random.normal(key, (2, 4, 16, 16), jnp.float32)
    interp = Interpolate(mode="bilinear")

    # Case 1: f32 upsample (W-first path)
    out = jax.block_until_ready(interp(x, (32, 24)))
    assert out.shape == (2, 4, 32, 24), out.shape
    assert bool(jnp.all(jnp.isfinite(out)))
    ref = _reference_interpolate(x, (32, 24))
    # default MXU precision (bf16 passes, f32 accumulate) -> loose tolerance
    assert bool(jnp.allclose(out, ref, atol=2e-2, rtol=2e-2)), \
        float(jnp.max(jnp.abs(out - ref)))

    # Case 2: f32 downsample + identity W axis (H-first path)
    out2 = jax.block_until_ready(interp(x, (8, 16)))
    ref2 = _reference_interpolate(x, (8, 16))
    assert out2.shape == (2, 4, 8, 16), out2.shape
    assert bool(jnp.allclose(out2, ref2, atol=2e-2, rtol=2e-2)), \
        float(jnp.max(jnp.abs(out2 - ref2)))

    # Case 3: bf16 input stays on the bf16 MXU path
    xb = x.astype(jnp.bfloat16)
    out3 = jax.block_until_ready(interp(xb, (32, 24)))
    assert out3.dtype == jnp.bfloat16
    ref3 = _reference_interpolate(xb, (32, 24))
    assert bool(jnp.allclose(out3.astype(jnp.float32), ref3, atol=1e-1, rtol=1e-1)), \
        float(jnp.max(jnp.abs(out3.astype(jnp.float32) - ref3)))

    print("KERNEL_OK")
</pallas_src>

<mosaic_0001>
module attributes {stable_mosaic.version = 11 : i64} {
  func.func @kernel(%arg0: i32, %arg1: i32, %arg2: memref<32x16xf32, #tpu.memory_space<vmem>>, %arg3: memref<16x24xf32, #tpu.memory_space<vmem>>, %arg4: memref<8x16x16xf32, #tpu.memory_space<vmem>>, %arg5: memref<8x32x24xf32, #tpu.memory_space<vmem>>) attributes {dimension_semantics = [#tpu.dimension_semantics<parallel>, #tpu.dimension_semantics<parallel>], iteration_bounds = array<i64: 1, 1>, scalar_prefetch = 0 : i64, scratch_operands = 0 : i64, tpu.core_type = #tpu.core_type<tc>, window_params = [{pipeline_mode = #tpu.pipeline_mode<synchronous>, transform_indices = @transform_0, window_bounds = array<i64: 32, 16>}, {transform_indices = @transform_1, window_bounds = array<i64: 16, 24>}, {transform_indices = @transform_2, window_bounds = array<i64: 8, 16, 16>}, {transform_indices = @transform_3, window_bounds = array<i64: 8, 32, 24>}]} {
    %c0 = arith.constant 0 : index
    %c0_0 = arith.constant 0 : index
    %c0_1 = arith.constant 0 : index
    %0 = vector.load %arg4[%c0, %c0_0, %c0_1] : memref<8x16x16xf32, #tpu.memory_space<vmem>>, vector<8x16x16xf32>
    %c0_2 = arith.constant 0 : index
    %c0_3 = arith.constant 0 : index
    %1 = vector.load %arg2[%c0_2, %c0_3] : memref<32x16xf32, #tpu.memory_space<vmem>>, vector<32x16xf32>
    %c0_4 = arith.constant 0 : index
    %c0_5 = arith.constant 0 : index
    %2 = vector.load %arg3[%c0_4, %c0_5] : memref<16x24xf32, #tpu.memory_space<vmem>>, vector<16x24xf32>
    %3 = vector.shape_cast %0 : vector<8x16x16xf32> to vector<128x16xf32>
    %cst = arith.constant dense<0.000000e+00> : vector<128x24xf32>
    %4 = tpu.matmul %3, %2, %cst {dimension_numbers = #tpu.dot_dimension_numbers<[1], [0], [0], [1], [0, 0, 1, 1], [], []>} : vector<128x16xf32>, vector<16x24xf32>, vector<128x24xf32> -> vector<128x24xf32>
    %5 = vector.shape_cast %4 : vector<128x24xf32> to vector<8x16x24xf32>
    %6 = vector.shape_cast %1 : vector<32x16xf32> to vector<1x32x16xf32>
    %7 = vector.shape_cast %6 : vector<1x32x16xf32> to vector<1x32x16xf32>
    %8 = vector.broadcast %7 : vector<1x32x16xf32> to vector<8x32x16xf32>
    %cst_6 = arith.constant dense<0.000000e+00> : vector<8x32x24xf32>
    %9 = tpu.matmul %8, %5, %cst_6 {dimension_numbers = #tpu.dot_dimension_numbers<[2], [1], [1], [2], [0, 0, 0, 1, 1, 2], [0], [0]>} : vector<8x32x16xf32>, vector<8x16x24xf32>, vector<8x32x24xf32> -> vector<8x32x24xf32>
    %c0_7 = arith.constant 0 : index
    %c0_8 = arith.constant 0 : index
    %c0_9 = arith.constant 0 : index
    %10 = vector.load %arg5[%c0_7, %c0_8, %c0_9] : memref<8x32x24xf32, #tpu.memory_space<vmem>>, vector<8x32x24xf32>
    tpu.vector_store %arg5[%c0_7, %c0_8, %c0_9], %9 {strides = array<i32>} : memref<8x32x24xf32, #tpu.memory_space<vmem>>, vector<8x32x24xf32>,
    return
  }
  func.func @transform_0(%arg0: i32, %arg1: i32) -> (i32, i32) {
    %c0_i32 = arith.constant 0 : i32
    %c0_i32_0 = arith.constant 0 : i32
    %c0_i32_1 = arith.constant 0 : i32
    return %c0_i32, %c0_i32_0 : i32, i32
  }
  func.func @transform_1(%arg0: i32, %arg1: i32) -> (i32, i32) {
    %c0_i32 = arith.constant 0 : i32
    %c0_i32_0 = arith.constant 0 : i32
    return %c0_i32, %arg1 : i32, i32
  }
  func.func @transform_2(%arg0: i32, %arg1: i32) -> (i32, i32, i32) {
    %c0_i32 = arith.constant 0 : i32
    %c0_i32_0 = arith.constant 0 : i32
    %c0_i32_1 = arith.constant 0 : i32
    return %arg0, %c0_i32, %c0_i32_0 : i32, i32, i32
  }
  func.func @transform_3(%arg0: i32, %arg1: i32) -> (i32, i32, i32) {
    %c0_i32 = arith.constant 0 : i32
    %c0_i32_0 = arith.constant 0 : i32
    return %arg0, %c0_i32, %arg1 : i32, i32, i32
  }
}

</mosaic_0001>

<bundles_post_ra>
// kernel: tpu_custom_call.1
= control target key start
LH: loop header
LB: loop body
LE: loop exit
PB: predicated region body
PF: predicated region fallthrough
CT: control target
= control target key end

     0   :  { %8 = vsyncpa [#allocation3], 0  ;;  %s1259_s12 = smov [#allocation2]   ;;  %s1508_s0 = inlined_call_operand.vmem [shape: f32[32,16], index: 0, kind: input, shape index: {}]   ;;  %s1509_s1 = inlined_call_operand.vmem [shape: f32[16,24], index: 1, kind: input, shape index: {}]   ;;  %s1510_s2 = inlined_call_operand.hbm [shape: f32[8,16,16], index: 2, kind: input, shape index: {}]   ;;  %s1511_s3 = inlined_call_operand.vmem [shape: f32[8,32,24], index: 3, kind: output, shape index: {}]  }
   0x1   :  { %s18_s13 = sshll.u32 %s1259_s12, 4  ;;  %s1235_s16 = scalar_lea.hbm %s1510_s2, 2048  ;;  %s19_s13 = int_to_ptr.vmem [resolvable:$true] %s18_s13 }
   0x2   :  { %p1236_p0 = scmp.ne.s32.totalorder %s1510_s2, %s1235_s16  ;;  %p1239_p1 = scmp.lt.u32.totalorder %s1235_s16, %s1510_s2 }
   0x4   :  { %p1241_p2 = pnand %p1239_p1, %p1236_p0 }
   0x6   :  { %1244 = shalt.err (!%p1241_p2)
}
   0x7   :  { %s1245_s21 = scalar_lea.vmem %s19_s13, 2048  ;;  %p1250_p4 = scmp.lt.s32.totalorder %s19_s13, %s19_s13 }
   0x8   :  { %p1246_p3 = scmp.ne.s32.totalorder %s19_s13, %s1245_s21  ;;  %p1251_p5 = scmp.lt.s32.totalorder %s1245_s21, %s1245_s21 }
   0xa   :  { %p1252_p6 = por %p1251_p5, %p1250_p4 }
   0xc   :  { %p1253_p7 = pnand %p1252_p6, %p1246_p3 }
   0xe   :  { %1256 = shalt.err (!%p1253_p7)
}
   0xf   :  { %s1260_s22 = smov 128   ;;  %s1261_s23 = smov 8  }
  0x10   :  { %24 = dma.hbm_to_vmem [thread:$0]  %s1510_s2, 2048, %s19_s13, [#allocation3], %s1260_s22, %s1260_s22, %s1261_s23  }
  0x11   :  { %1257 = dma.done.wait [#allocation3], 2048  }
  0x12   :  { %1258 = vsyncadd [#allocation3], 4294965248  ;;  %vm50_vm0 = vcmask 130048   ;;  %v48_v0 = vld [vmem:[%s1509_s1] sm:$0xff]  ;;  %v49_v1 = vld [vmem:[%s1509_s1 + $0x8] sm:$0xff]  ;;  %vm936_vm1 = vcmask 195584  }
  0x13   :  { %v28_v2 = vld [vmem:[#allocation2] sm:$0xff]  ;;  %v1196_v3 = vpack.c.bf16 %v49_v1, %v48_v0  ;;  %v29_v4 = vld [vmem:[#allocation2 + $0x8] sm:$0xff]  ;;  %v30_v5 = vld [vmem:[#allocation2 + $0x10] sm:$0xff] }
  0x14   :  { %1092 = vmatprep.mubr.msk.f32.mxu0 %vm50_vm0, %v28_v2  ;;  %v31_v6 = vld [vmem:[#allocation2 + $0x18] sm:$0xff]  ;;  %v32_v7 = vld [vmem:[#allocation2 + $0x20] sm:$0xff]  ;;  %v33_v8 = vld [vmem:[#allocation2 + $0x28] sm:$0xff] }
  0x15   :  { %1197 = vmatprep.subr.bf16.mxu0 %v1196_v3  ;;  %v34_v9 = vld [vmem:[#allocation2 + $0x30] sm:$0xff]  ;;  %v35_v10 = vld [vmem:[#allocation2 + $0x38] sm:$0xff]  ;;  %v36_v11 = vld [vmem:[#allocation2 + $0x40] sm:$0xff] }
  0x16   :  { %1199 = vmatpush3.bf16.msra.mxu0 %v1196_v3  ;;  %v37_v12 = vld [vmem:[#allocation2 + $0x48] sm:$0xff]  ;;  %v38_v13 = vld [vmem:[#allocation2 + $0x50] sm:$0xff]  ;;  %v39_v14 = vld [vmem:[#allocation2 + $0x58] sm:$0xff] }
  0x17   :  { %v40_v15 = vld [vmem:[#allocation2 + $0x60] sm:$0xff]  ;;  %v41_v16 = vld [vmem:[#allocation2 + $0x68] sm:$0xff]  ;;  %v42_v17 = vld [vmem:[#allocation2 + $0x70] sm:$0xff] }
  0x18   :  { %v43_v18 = vld [vmem:[#allocation2 + $0x78] sm:$0xff]  ;;  %v1319_v19 = vld [vmem:[%s1508_s0] sm:$0xff]  ;;  %v1328_v25 = vld [vmem:[%s1508_s0 + $0x8] sm:$0xff] }
  0x19   :  { %1093 = vmatmul.mubr.msk.f32.vlgmr.msra.gmra.mrb[0].mxu0 %vm50_vm0, %v29_v4  ;;  %1120 = vmatprep.mubr.msk.f32.mxu1 %vm50_vm0, %v1319_v19  ;;  %v46_v27 = vld [vmem:[%s1508_s0 + $0x10] sm:$0xff]  ;;  %v47_v30 = vld [vmem:[%s1508_s0 + $0x18] sm:$0xff] }
  0x1a   :  { %1095 = vmatprep.mubr.msk.f32.mxu0 %vm50_vm0, %v30_v5 }
  0x1d   :  { %1096 = vmatmul.mubr.msk.f32.gmra.mrb[2].mxu0 %vm50_vm0, %v31_v6 }
  0x1e   :  { %1098 = vmatprep.mubr.msk.f32.mxu0 %vm50_vm0, %v32_v7 }
  0x21   :  { %1099 = vmatmul.mubr.msk.f32.gmra.mrb[4].mxu0 %vm50_vm0, %v33_v8 }
  0x22   :  { %1101 = vmatprep.mubr.msk.f32.mxu0 %vm50_vm0, %v34_v9 }
  0x25   :  { %1102 = vmatmul.mubr.msk.f32.gmra.mrb[6].mxu0 %vm50_vm0, %v35_v10 }
  0x26   :  { %1104 = vmatprep.mubr.msk.f32.mxu0 %vm50_vm0, %v36_v11 }
  0x29   :  { %1105 = vmatmul.mubr.msk.f32.gmra.mrb[8].mxu0 %vm50_vm0, %v37_v12 }
  0x2a   :  { %1107 = vmatprep.mubr.msk.f32.mxu0 %vm50_vm0, %v38_v13 }
  0x2d   :  { %1108 = vmatmul.mubr.msk.f32.gmra.mrb[10].mxu0 %vm50_vm0, %v39_v14 }
  0x2e   :  { %1110 = vmatprep.mubr.msk.f32.mxu0 %vm50_vm0, %v40_v15 }
  0x31   :  { %1111 = vmatmul.mubr.msk.f32.gmra.mrb[12].mxu0 %vm50_vm0, %v41_v16 }
  0x32   :  { %1113 = vmatprep.mubr.msk.f32.mxu0 %vm50_vm0, %v42_v17 }
  0x35   :  { %1114 = vmatmul.mubr.msk.f32.gmra.mrb[14].mxu0 %vm50_vm0, %v43_v18 }
  0x36   :  { %1160 = vmatprep.mubr.msk.f32.mxu0 %vm50_vm0, %v1319_v19 }
  0xec   :  { %v1094_v20 = vpop.f32.mrb[0].mxu0 }
  0xed   :  { %v165_v21 = vpop.f32.mrb[1].mxu0 }
  0xee   :  { %v1200_v22 = vpack.c.bf16 %v1094_v20, %v165_v21 }
  0xf0   :  { %v1097_v23 = vpop.f32.mrb[2].mxu0  ;;  %1201 = vmatprep.subr.bf16.mxu1 %v1200_v22 }
  0xf1   :  { %v175_v24 = vpop.f32.mrb[3].mxu0  ;;  %1203 = vmatpush3.bf16.msra.mxu1 %v1200_v22 }
  0xf2   :  { %v1204_v26 = vpack.c.bf16 %v1097_v23, %v175_v24 }
  0xf4   :  { %v1100_v28 = vpop.f32.mrb[4].mxu0  ;;  %1121 = vmatmul.mubr.msk.f32.vlgmr.msra.gmra.mrb[0].mxu1 %vm50_vm0, %v1328_v25  ;;  %1205 = vmatprep.subr.bf16.mxu1 %v1204_v26 }
  0xf5   :  { %v185_v29 = vpop.f32.mrb[5].mxu0  ;;  %1207 = vmatpush3.bf16.msra.mxu1 %v1204_v26  ;;  %1123 = vmatprep.mubr.msk.f32.mxu1 %vm50_vm0, %v46_v27 }
  0xf6   :  { %v1208_v31 = vpack.c.bf16 %v1100_v28, %v185_v29 }
  0xf8   :  { %v1103_v32 = vpop.f32.mrb[6].mxu0  ;;  %1124 = vmatmul.mubr.msk.f32.gmra.mrb[2].mxu1 %vm50_vm0, %v47_v30  ;;  %1209 = vmatprep.subr.bf16.mxu1 %v1208_v31 }
  0xf9   :  { %v195_v33 = vpop.f32.mrb[7].mxu0  ;;  %1130 = vmatprep.mubr.msk.f32.mxu1 %vm50_vm0, %v1319_v19 }
  0xfa   :  { %v1212_v34 = vpack.c.bf16 %v1103_v32, %v195_v33 }
  0xfc   :  { %v1106_v35 = vpop.f32.mrb[8].mxu0  ;;  %1131 = vmatmul.mubr.msk.f32.vlgmr.msra.gmra.mrb[4].mxu1 %vm50_vm0, %v1328_v25 }
  0xfd   :  { %1211 = vmatpush3.bf16.msra.mxu1 %v1208_v31  ;;  %v205_v36 = vpop.f32.mrb[9].mxu0  ;;  %1133 = vmatprep.mubr.msk.f32.mxu1 %vm50_vm0, %v46_v27 }
  0xfe   :  { %v1216_v37 = vpack.c.bf16 %v1106_v35, %v205_v36  ;;  %1213 = vmatprep.subr.bf16.mxu1 %v1212_v34 }
 0x100   :  { %1134 = vmatmul.mubr.msk.f32.gmra.mrb[6].mxu1 %vm50_vm0, %v47_v30  ;;  %1217 = vmatprep.subr.bf16.mxu0 %v1216_v37  ;;  %v1109_v38 = vpop.f32.mrb[10].mxu0 }
 0x101   :  { %1219 = vmatpush3.bf16.msra.mxu0 %v1216_v37  ;;  %1140 = vmatprep.mubr.msk.f32.mxu1 %vm50_vm0, %v1319_v19  ;;  %v215_v39 = vpop.f32.mrb[11].mxu0 }
 0x102   :  { %v1220_v40 = vpack.c.bf16 %v1109_v38, %v215_v39 }
 0x104   :  { %1141 = vmatmul.mubr.msk.f32.vlgmr.msra.gmra.mrb[8].mxu1 %vm50_vm0, %v1328_v25  ;;  %v1112_v41 = vpop.f32.mrb[12].mxu0  ;;  %1161 = vmatmul.mubr.msk.f32.vlgmr.msra.gmra.mrb[16].mxu0 %vm50_vm0, %v1328_v25 }
 0x105   :  { %1215 = vmatpush3.bf16.msra.mxu1 %v1212_v34  ;;  %1143 = vmatprep.mubr.msk.f32.mxu1 %vm50_vm0, %v46_v27  ;;  %v225_v42 = vpop.f32.mrb[13].mxu0 }
 0x106   :  { %1221 = vmatprep.subr.bf16.mxu1 %v1220_v40  ;;  %v1224_v43 = vpack.c.bf16 %v1112_v41, %v225_v42  ;;  %1163 = vmatprep.mubr.msk.f32.mxu0 %vm50_vm0, %v46_v27 }
 0x108   :  { %1144 = vmatmul.mubr.msk.f32.gmra.mrb[10].mxu1 %vm50_vm0, %v47_v30  ;;  %v1115_v44 = vpop.f32.mrb[14].mxu0  ;;  %1225 = vmatprep.subr.bf16.mxu0 %v1224_v43 }
 0x109   :  { %1150 = vmatprep.mubr.msk.f32.mxu1 %vm50_vm0, %v1319_v19  ;;  %v235_v45 = vpop.f32.mrb[15].mxu0  ;;  %1227 = vmatpush3.bf16.msra.mxu0 %v1224_v43 }
 0x10a   :  { %v1228_v46 = vpack.c.bf16 %v1115_v44, %v235_v45  ;;  %1164 = vmatmul.mubr.msk.f32.gmra.mrb[18].mxu0 %vm50_vm0, %v47_v30 }
 0x10b   :  { %1180 = vmatprep.mubr.msk.f32.mxu0 %vm50_vm0, %v1319_v19 }
 0x10c   :  { %1151 = vmatmul.mubr.msk.f32.vlgmr.msra.gmra.mrb[12].mxu1 %vm50_vm0, %v1328_v25 }
 0x10d   :  { %1223 = vmatpush3.bf16.msra.mxu1 %v1220_v40  ;;  %1153 = vmatprep.mubr.msk.f32.mxu1 %vm50_vm0, %v46_v27 }
 0x10e   :  { %1229 = vmatprep.subr.bf16.mxu1 %v1228_v46  ;;  %1181 = vmatmul.mubr.msk.f32.vlgmr.msra.gmra.mrb[20].mxu0 %vm50_vm0, %v1328_v25 }
 0x10f   :  { %1183 = vmatprep.mubr.msk.f32.mxu0 %vm50_vm0, %v46_v27 }
 0x110   :  { %1154 = vmatmul.mubr.msk.f32.gmra.mrb[14].mxu1 %vm50_vm0, %v47_v30 }
 0x111   :  { %1170 = vmatprep.mubr.msk.f32.mxu1 %vm50_vm0, %v1319_v19 }
 0x112   :  { %1184 = vmatmul.mubr.msk.f32.gmra.mrb[22].mxu0 %vm50_vm0, %v47_v30 }
 0x114   :  { %1171 = vmatmul.mubr.msk.f32.vlgmr.msra.gmra.mrb[16].mxu1 %vm50_vm0, %v1328_v25 }
 0x115   :  { %1231 = vmatpush3.bf16.msra.mxu1 %v1228_v46  ;;  %1173 = vmatprep.mubr.msk.f32.mxu1 %vm50_vm0, %v46_v27 }
 0x118   :  { %1174 = vmatmul.mubr.msk.f32.gmra.mrb[18].mxu1 %vm50_vm0, %v47_v30 }
 0x119   :  { %1190 = vmatprep.mubr.msk.f32.mxu1 %vm50_vm0, %v1319_v19 }
 0x11c   :  { %1191 = vmatmul.mubr.msk.f32.vlgmr.msra.gmra.mrb[20].mxu1 %vm50_vm0, %v1328_v25 }
 0x11d   :  { %1193 = vmatprep.mubr.msk.f32.mxu1 %vm50_vm0, %v46_v27 }
 0x120   :  { %1194 = vmatmul.mubr.msk.f32.gmra.mrb[22].mxu1 %vm50_vm0, %v47_v30 }
 0x1c7   :  { %v1122_v47 = vpop.f32.mrb[0].mxu1 }
 0x1c8   :  { %938 = vst.msk [vmem:[%s1511_s3 + $0x8] sm:$0xff] %vm936_vm1, %v1122_v47  ;;  %v322_v48 = vpop.f32.mrb[1].mxu1 }
 0x1c9   :  { %937 = vst.msk [vmem:[%s1511_s3] sm:$0xff] %vm936_vm1, %v322_v48 }
 0x1cb   :  { %v1125_v49 = vpop.f32.mrb[2].mxu1 }
 0x1cc   :  { %940 = vst.msk [vmem:[%s1511_s3 + $0x18] sm:$0xff] %vm936_vm1, %v1125_v49  ;;  %v332_v50 = vpop.f32.mrb[3].mxu1 }
 0x1cd   :  { %939 = vst.msk [vmem:[%s1511_s3 + $0x10] sm:$0xff] %vm936_vm1, %v332_v50 }
 0x1cf   :  { %v1132_v51 = vpop.f32.mrb[4].mxu1 }
 0x1d0   :  { %942 = vst.msk [vmem:[%s1511_s3 + $0x28] sm:$0xff] %vm936_vm1, %v1132_v51  ;;  %v407_v52 = vpop.f32.mrb[5].mxu1 }
 0x1d1   :  { %941 = vst.msk [vmem:[%s1511_s3 + $0x20] sm:$0xff] %vm936_vm1, %v407_v52 }
 0x1d3   :  { %v1135_v53 = vpop.f32.mrb[6].mxu1 }
 0x1d4   :  { %944 = vst.msk [vmem:[%s1511_s3 + $0x38] sm:$0xff] %vm936_vm1, %v1135_v53  ;;  %v417_v54 = vpop.f32.mrb[7].mxu1 }
 0x1d5   :  { %943 = vst.msk [vmem:[%s1511_s3 + $0x30] sm:$0xff] %vm936_vm1, %v417_v54 }
 0x1d7   :  { %v1142_v55 = vpop.f32.mrb[8].mxu1  ;;  %v1162_v56 = vpop.f32.mrb[16].mxu0 }
 0x1d8   :  { %946 = vst.msk [vmem:[%s1511_s3 + $0x48] sm:$0xff] %vm936_vm1, %v1142_v55  ;;  %v492_v57 = vpop.f32.mrb[9].mxu1  ;;  %954 = vst.msk [vmem:[%s1511_s3 + $0x88] sm:$0xff] %vm936_vm1, %v1162_v56  ;;  %v662_v58 = vpop.f32.mrb[17].mxu0 }
 0x1d9   :  { %945 = vst.msk [vmem:[%s1511_s3 + $0x40] sm:$0xff] %vm936_vm1, %v492_v57  ;;  %953 = vst.msk [vmem:[%s1511_s3 + $0x80] sm:$0xff] %vm936_vm1, %v662_v58 }
 0x1db   :  { %v1145_v59 = vpop.f32.mrb[10].mxu1 }
 0x1dc   :  { %948 = vst.msk [vmem:[%s1511_s3 + $0x58] sm:$0xff] %vm936_vm1, %v1145_v59  ;;  %v502_v60 = vpop.f32.mrb[11].mxu1 }
 0x1dd   :  { %947 = vst.msk [vmem:[%s1511_s3 + $0x50] sm:$0xff] %vm936_vm1, %v502_v60  ;;  %v1165_v61 = vpop.f32.mrb[18].mxu0 }
 0x1de   :  { %956 = vst.msk [vmem:[%s1511_s3 + $0x98] sm:$0xff] %vm936_vm1, %v1165_v61  ;;  %v672_v62 = vpop.f32.mrb[19].mxu0 }
 0x1df   :  { %v1152_v63 = vpop.f32.mrb[12].mxu1  ;;  %955 = vst.msk [vmem:[%s1511_s3 + $0x90] sm:$0xff] %vm936_vm1, %v672_v62 }
 0x1e0   :  { %950 = vst.msk [vmem:[%s1511_s3 + $0x68] sm:$0xff] %vm936_vm1, %v1152_v63  ;;  %v577_v0 = vpop.f32.mrb[13].mxu1 }
 0x1e1   :  { %949 = vst.msk [vmem:[%s1511_s3 + $0x60] sm:$0xff] %vm936_vm1, %v577_v0  ;;  %v1182_v1 = vpop.f32.mrb[20].mxu0 }
 0x1e2   :  { %962 = vst.msk [vmem:[%s1511_s3 + $0xc8] sm:$0xff] %vm936_vm1, %v1182_v1  ;;  %v832_v2 = vpop.f32.mrb[21].mxu0 }
 0x1e3   :  { %v1155_v3 = vpop.f32.mrb[14].mxu1  ;;  %961 = vst.msk [vmem:[%s1511_s3 + $0xc0] sm:$0xff] %vm936_vm1, %v832_v2 }
 0x1e4   :  { %952 = vst.msk [vmem:[%s1511_s3 + $0x78] sm:$0xff] %vm936_vm1, %v1155_v3  ;;  %v587_v4 = vpop.f32.mrb[15].mxu1 }
 0x1e5   :  { %951 = vst.msk [vmem:[%s1511_s3 + $0x70] sm:$0xff] %vm936_vm1, %v587_v4  ;;  %v1185_v5 = vpop.f32.mrb[22].mxu0 }
 0x1e6   :  { %964 = vst.msk [vmem:[%s1511_s3 + $0xd8] sm:$0xff] %vm936_vm1, %v1185_v5  ;;  %v842_v6 = vpop.f32.mrb[23].mxu0 }
 0x1e7   :  { %v1172_v7 = vpop.f32.mrb[16].mxu1  ;;  %963 = vst.msk [vmem:[%s1511_s3 + $0xd0] sm:$0xff] %vm936_vm1, %v842_v6 }
 0x1e8   :  { %958 = vst.msk [vmem:[%s1511_s3 + $0xa8] sm:$0xff] %vm936_vm1, %v1172_v7  ;;  %v747_v8 = vpop.f32.mrb[17].mxu1 }
 0x1e9   :  { %957 = vst.msk [vmem:[%s1511_s3 + $0xa0] sm:$0xff] %vm936_vm1, %v747_v8 }
 0x1eb   :  { %v1175_v9 = vpop.f32.mrb[18].mxu1 }
 0x1ec   :  { %960 = vst.msk [vmem:[%s1511_s3 + $0xb8] sm:$0xff] %vm936_vm1, %v1175_v9  ;;  %v757_v10 = vpop.f32.mrb[19].mxu1 }
 0x1ed   :  { %959 = vst.msk [vmem:[%s1511_s3 + $0xb0] sm:$0xff] %vm936_vm1, %v757_v10 }
 0x1ef   :  { %v1192_v11 = vpop.f32.mrb[20].mxu1 }
 0x1f0   :  { %966 = vst.msk [vmem:[%s1511_s3 + $0xe8] sm:$0xff] %vm936_vm1, %v1192_v11  ;;  %v917_v12 = vpop.f32.mrb[21].mxu1 }
 0x1f1   :  { %965 = vst.msk [vmem:[%s1511_s3 + $0xe0] sm:$0xff] %vm936_vm1, %v917_v12 }
 0x1f3   :  { %v1195_v13 = vpop.f32.mrb[22].mxu1 }
 0x1f4   :  { %968 = vst.msk [vmem:[%s1511_s3 + $0xf8] sm:$0xff] %vm936_vm1, %v1195_v13  ;;  %v927_v14 = vpop.f32.mrb[23].mxu1 }
 0x1f5   :  { %967 = vst.msk [vmem:[%s1511_s3 + $0xf0] sm:$0xff] %vm936_vm1, %v927_v14 }
 0x1f6   :  { %973 = vsyncpa [#allocation3], 1 }

</bundles_post_ra>
